<compile_context>
chip_gen: v5e
topology: v5e:2x2
jax: 0.10.0
libtpu: 0.0.40
codegen_flags: <defaults>
</compile_context>

<pallas_src>
import math

import jax
import jax.numpy as jnp
from jax.experimental import pallas as pl
from jax.experimental.pallas import tpu as pltpu


def critic_kernel(gs_ref, act_ref, w1_ref, b1_ref, w2s_ref, w2a_ref, w3_ref,
                  out_ref):
    """Fused Critic forward in [features, batch] orientation."""
    gs = gs_ref[...].astype(jnp.bfloat16)      # [G+S, tb]
    act = act_ref[...].astype(jnp.bfloat16)    # [A,   tb]

    # xs = relu(W1 @ [goal; state] + b1)                       -> [F1, tb]
    xs = jnp.dot(w1_ref[...], gs, preferred_element_type=jnp.float32)
    xs = jnp.maximum(xs + b1_ref[...], 0.0)

    # h = relu(W2 @ [xs; action]) = relu(W2s @ xs + W2a @ act) -> [F2, tb]
    h = jnp.dot(w2s_ref[...], xs.astype(jnp.bfloat16),
                preferred_element_type=jnp.float32)
    h = h + jnp.dot(w2a_ref[...], act, preferred_element_type=jnp.float32)
    h = jnp.maximum(h, 0.0)

    # q = w3 @ h has a single output row: VPU multiply + sublane reduce keeps
    # the MXU free and the store is a lane-dense [1, tb] slab.
    out_ref[...] = jnp.sum(h * w3_ref[...], axis=0, keepdims=True)


def _round_up(x, m):
    return ((x + m - 1) // m) * m


def critic_forward(goal, state, action, params, *, max_tile_b=2048,
                   wrap_value=None):
    """params (torch-native [out, in] layout, pre-split only across the
    xs/action concat of fc2):
         w1  [F1, G+S] bf16, b1 [F1, 1] f32,
         w2s [F2, F1]  bf16, w2a [F2, A] bf16, w3 [F2, 1] f32.
    """
    if goal.ndim == state.ndim:
        gs = jnp.concatenate([goal, state], axis=-1)
    else:
        # Original module skips the concat; `state` already has the full
        # fcs1 input width and the stacked W1 applies to it unchanged.
        gs = state

    B = gs.shape[0]
    F1, GS = params["w1"].shape
    F2, A = params["w2a"].shape

    # Transposed activations: batch on the lane axis.
    gs_t = gs.astype(jnp.float32).T            # [G+S, B]
    act_t = action.astype(jnp.float32).T       # [A,   B]

    # Tile selection: full block for small batches; otherwise 128-multiple
    # lane tiles with at least 2 grid steps so v7x can shard across both TCs.
    if B <= 128:
        tile_b = B
    else:
        tile_b = min(max_tile_b, _round_up(pl.cdiv(B, 2), 128))
    grid = (pl.cdiv(B, tile_b),)

    def act_spec(rows):
        return pl.BlockSpec((rows, tile_b), lambda i: (0, i))

    def weight_spec(shape):
        # Constant block index -> weight stays resident across the batch grid.
        return pl.BlockSpec(shape, lambda i: (0, 0))

    flops = 2 * B * (GS * F1 + (F1 + A) * F2 + F2)
    bytes_accessed = (
        (gs.size + action.size) * 4
        + sum(int(p.size) * p.dtype.itemsize for p in params.values())
        + B * 4)

    q_t = pl.pallas_call(
        critic_kernel,
        out_shape=jax.ShapeDtypeStruct((1, B), jnp.float32),
        grid=grid,
        in_specs=[
            act_spec(GS), act_spec(A),
            weight_spec(params["w1"].shape),
            weight_spec(params["b1"].shape),
            weight_spec(params["w2s"].shape),
            weight_spec(params["w2a"].shape),
            weight_spec(params["w3"].shape),
        ],
        out_specs=pl.BlockSpec((1, tile_b), lambda i: (0, i)),
        compiler_params=pltpu.CompilerParams(
            dimension_semantics=("parallel",)),   # v7x: shard batch across TCs
        cost_estimate=pl.CostEstimate(
            flops=int(flops), transcendentals=0,
            bytes_accessed=int(bytes_accessed)),
    )(gs_t, act_t, params["w1"], params["b1"], params["w2s"], params["w2a"],
      params["w3"])

    q = q_t.reshape(B, 1)

    # wrap_value is an externally injected callable; identity is used here.
    # TODO(synk): plug in the real cfg-provided wrap_value if it is not identity.
    if wrap_value is not None:
        q = wrap_value(q)
    return q


def init_params(key, state_size, action_size, her_state_features,
                fcs1_units, fc2_units):
    """Deterministic init mirroring Critic.reset_parameters().

    hidden_init() in the reference uses weight.size(0) == out_features as
    'fan_in'; replicated exactly.  Matmul weights are kept in torch's
    [out, in] layout (good for the transposed kernel) and stored bf16; W2 is
    split along its input dim so the [xs, action] concat becomes a sum of
    matmuls.  NOTE: bf16 MXU operands will not bit-match an f32 torch run.
    """
    k1, k2, k3, k4 = jax.random.split(key, 4)

    lim1 = 1.0 / math.sqrt(fcs1_units)          # weight.size(0) of fcs1
    lim2 = 1.0 / math.sqrt(fc2_units)           # weight.size(0) of fc2
    lim3 = 0.0003

    s_in = state_size + her_state_features
    w1 = jax.random.uniform(k1, (fcs1_units, s_in), jnp.float32, -lim1, lim1)
    b1 = jax.random.uniform(k2, (fcs1_units, 1), jnp.float32, -lim1, lim1)
    w2 = jax.random.uniform(k3, (fc2_units, fcs1_units + action_size),
                            jnp.float32, -lim2, lim2)
    w3 = jax.random.uniform(k4, (fc2_units, 1), jnp.float32, -lim3, lim3)

    return {
        "w1": w1.astype(jnp.bfloat16),                      # [F1, G+S]
        "b1": b1,                                           # [F1, 1] f32
        "w2s": w2[:, :fcs1_units].astype(jnp.bfloat16),     # [F2, F1]
        "w2a": w2[:, fcs1_units:].astype(jnp.bfloat16),     # [F2, A]
        "w3": w3,                                           # [F2, 1] f32 (VPU)
    }


def reference_forward(goal, state, action, params):
    """Pure-JAX reference with the same bf16-weight / f32-accumulate numerics."""
    if goal.ndim == state.ndim:
        gs = jnp.concatenate([goal, state], axis=-1)
    else:
        gs = state
    xs = jnp.dot(gs.astype(jnp.bfloat16), params["w1"].T,
                 preferred_element_type=jnp.float32)
    xs = jax.nn.relu(xs + params["b1"].reshape(1, -1))
    h = (jnp.dot(xs.astype(jnp.bfloat16), params["w2s"].T,
                 preferred_element_type=jnp.float32)
         + jnp.dot(action.astype(jnp.bfloat16), params["w2a"].T,
                   preferred_element_type=jnp.float32))
    h = jax.nn.relu(h)
    return jnp.dot(h, params["w3"])                         # [B, 1]


if __name__ == "__main__":
    # Small, module-consistent shapes.
    state_size = 8
    her_state_features = 4
    action_size = 4
    fcs1_units = 64
    fc2_units = 32

    key = jax.random.PRNGKey(0)
    kp, kd = jax.random.split(key)
    params = init_params(kp, state_size, action_size, her_state_features,
                         fcs1_units, fc2_units)

    for batch in (8, 256):   # grid=(1,) path and multi-step (megacore) path
        kg, ks, ka = jax.random.split(jax.random.fold_in(kd, batch), 3)
        goal = jax.random.normal(kg, (batch, her_state_features), jnp.float32)
        state = jax.random.normal(ks, (batch, state_size), jnp.float32)
        action = jax.random.normal(ka, (batch, action_size), jnp.float32)

        q = critic_forward(goal, state, action, params)
        q = jax.block_until_ready(q)

        q_ref = reference_forward(goal, state, action, params)
        assert q.shape == (batch, 1), q.shape
        assert jnp.allclose(q, q_ref, rtol=2e-3, atol=1e-5), (q, q_ref)

    print("KERNEL_OK")
</pallas_src>

<mosaic_0001>
module attributes {stable_mosaic.version = 11 : i64} {
  func.func @critic_kernel(%arg0: i32, %arg1: memref<12x8xf32, #tpu.memory_space<vmem>>, %arg2: memref<4x8xf32, #tpu.memory_space<vmem>>, %arg3: memref<64x12xbf16, #tpu.memory_space<vmem>>, %arg4: memref<64x1xf32, #tpu.memory_space<vmem>>, %arg5: memref<32x64xbf16, #tpu.memory_space<vmem>>, %arg6: memref<32x4xbf16, #tpu.memory_space<vmem>>, %arg7: memref<32x1xf32, #tpu.memory_space<vmem>>, %arg8: memref<1x8xf32, #tpu.memory_space<vmem>>) attributes {dimension_semantics = [#tpu.dimension_semantics<parallel>], iteration_bounds = array<i64: 1>, scalar_prefetch = 0 : i64, scratch_operands = 0 : i64, tpu.core_type = #tpu.core_type<tc>, window_params = [{transform_indices = @transform_0, window_bounds = array<i64: 12, 8>}, {transform_indices = @transform_1, window_bounds = array<i64: 4, 8>}, {pipeline_mode = #tpu.pipeline_mode<synchronous>, transform_indices = @transform_2, window_bounds = array<i64: 64, 12>}, {pipeline_mode = #tpu.pipeline_mode<synchronous>, transform_indices = @transform_3, window_bounds = array<i64: 64, 1>}, {pipeline_mode = #tpu.pipeline_mode<synchronous>, transform_indices = @transform_4, window_bounds = array<i64: 32, 64>}, {pipeline_mode = #tpu.pipeline_mode<synchronous>, transform_indices = @transform_5, window_bounds = array<i64: 32, 4>}, {pipeline_mode = #tpu.pipeline_mode<synchronous>, transform_indices = @transform_6, window_bounds = array<i64: 32, 1>}, {transform_indices = @transform_7, window_bounds = array<i64: 1, 8>}]} {
    %c0 = arith.constant 0 : index
    %c0_0 = arith.constant 0 : index
    %0 = vector.load %arg1[%c0, %c0_0] : memref<12x8xf32, #tpu.memory_space<vmem>>, vector<12x8xf32>
    %1 = arith.truncf %0 : vector<12x8xf32> to vector<12x8xbf16>
    %c0_1 = arith.constant 0 : index
    %c0_2 = arith.constant 0 : index
    %2 = vector.load %arg2[%c0_1, %c0_2] : memref<4x8xf32, #tpu.memory_space<vmem>>, vector<4x8xf32>
    %3 = arith.truncf %2 : vector<4x8xf32> to vector<4x8xbf16>
    %c0_3 = arith.constant 0 : index
    %c0_4 = arith.constant 0 : index
    %4 = vector.load %arg3[%c0_3, %c0_4] : memref<64x12xbf16, #tpu.memory_space<vmem>>, vector<64x12xbf16>
    %cst = arith.constant dense<0.000000e+00> : vector<64x8xf32>
    %5 = tpu.matmul %4, %1, %cst {dimension_numbers = #tpu.dot_dimension_numbers<[1], [0], [0], [1], [0, 0, 1, 1], [], []>} : vector<64x12xbf16>, vector<12x8xbf16>, vector<64x8xf32> -> vector<64x8xf32>
    %c0_5 = arith.constant 0 : index
    %c0_6 = arith.constant 0 : index
    %6 = vector.load %arg4[%c0_5, %c0_6] : memref<64x1xf32, #tpu.memory_space<vmem>>, vector<64x1xf32>
    %7 = vector.broadcast %6 : vector<64x1xf32> to vector<64x8xf32>
    %8 = arith.addf %5, %7 : vector<64x8xf32>
    %cst_7 = arith.constant 0.000000e+00 : f32
    %9 = vector.broadcast %cst_7 : f32 to vector<64x8xf32>
    %10 = arith.maximumf %8, %9 : vector<64x8xf32>
    %c0_8 = arith.constant 0 : index
    %c0_9 = arith.constant 0 : index
    %11 = vector.load %arg5[%c0_8, %c0_9] : memref<32x64xbf16, #tpu.memory_space<vmem>>, vector<32x64xbf16>
    %12 = arith.truncf %10 : vector<64x8xf32> to vector<64x8xbf16>
    %cst_10 = arith.constant dense<0.000000e+00> : vector<32x8xf32>
    %13 = tpu.matmul %11, %12, %cst_10 {dimension_numbers = #tpu.dot_dimension_numbers<[1], [0], [0], [1], [0, 0, 1, 1], [], []>} : vector<32x64xbf16>, vector<64x8xbf16>, vector<32x8xf32> -> vector<32x8xf32>
    %c0_11 = arith.constant 0 : index
    %c0_12 = arith.constant 0 : index
    %14 = vector.load %arg6[%c0_11, %c0_12] : memref<32x4xbf16, #tpu.memory_space<vmem>>, vector<32x4xbf16>
    %cst_13 = arith.constant dense<0.000000e+00> : vector<32x8xf32>
    %15 = tpu.matmul %14, %3, %cst_13 {dimension_numbers = #tpu.dot_dimension_numbers<[1], [0], [0], [1], [0, 0, 1, 1], [], []>} : vector<32x4xbf16>, vector<4x8xbf16>, vector<32x8xf32> -> vector<32x8xf32>
    %16 = arith.addf %13, %15 : vector<32x8xf32>
    %cst_14 = arith.constant 0.000000e+00 : f32
    %17 = vector.broadcast %cst_14 : f32 to vector<32x8xf32>
    %18 = arith.maximumf %16, %17 : vector<32x8xf32>
    %c0_15 = arith.constant 0 : index
    %c0_16 = arith.constant 0 : index
    %19 = vector.load %arg7[%c0_15, %c0_16] : memref<32x1xf32, #tpu.memory_space<vmem>>, vector<32x1xf32>
    %20 = vector.broadcast %19 : vector<32x1xf32> to vector<32x8xf32>
    %21 = arith.mulf %18, %20 : vector<32x8xf32>
    %cst_17 = arith.constant dense<0.000000e+00> : vector<8xf32>
    %22 = vector.multi_reduction <add>, %21, %cst_17 [0] : vector<32x8xf32> to vector<8xf32>
    %23 = vector.shape_cast %22 : vector<8xf32> to vector<1x8xf32>
    %c0_18 = arith.constant 0 : index
    %c0_19 = arith.constant 0 : index
    %24 = vector.load %arg8[%c0_18, %c0_19] : memref<1x8xf32, #tpu.memory_space<vmem>>, vector<1x8xf32>
    tpu.vector_store %arg8[%c0_18, %c0_19], %23 {strides = array<i32>} : memref<1x8xf32, #tpu.memory_space<vmem>>, vector<1x8xf32>,
    return
  }
  func.func @transform_0(%arg0: i32) -> (i32, i32) {
    %c0_i32 = arith.constant 0 : i32
    %c0_i32_0 = arith.constant 0 : i32
    return %c0_i32, %arg0 : i32, i32
  }
  func.func @transform_1(%arg0: i32) -> (i32, i32) {
    %c0_i32 = arith.constant 0 : i32
    %c0_i32_0 = arith.constant 0 : i32
    return %c0_i32, %arg0 : i32, i32
  }
  func.func @transform_2(%arg0: i32) -> (i32, i32) {
    %c0_i32 = arith.constant 0 : i32
    %c0_i32_0 = arith.constant 0 : i32
    %c0_i32_1 = arith.constant 0 : i32
    return %c0_i32, %c0_i32_0 : i32, i32
  }
  func.func @transform_3(%arg0: i32) -> (i32, i32) {
    %c0_i32 = arith.constant 0 : i32
    %c0_i32_0 = arith.constant 0 : i32
    %c0_i32_1 = arith.constant 0 : i32
    return %c0_i32, %c0_i32_0 : i32, i32
  }
  func.func @transform_4(%arg0: i32) -> (i32, i32) {
    %c0_i32 = arith.constant 0 : i32
    %c0_i32_0 = arith.constant 0 : i32
    %c0_i32_1 = arith.constant 0 : i32
    return %c0_i32, %c0_i32_0 : i32, i32
  }
  func.func @transform_5(%arg0: i32) -> (i32, i32) {
    %c0_i32 = arith.constant 0 : i32
    %c0_i32_0 = arith.constant 0 : i32
    %c0_i32_1 = arith.constant 0 : i32
    return %c0_i32, %c0_i32_0 : i32, i32
  }
  func.func @transform_6(%arg0: i32) -> (i32, i32) {
    %c0_i32 = arith.constant 0 : i32
    %c0_i32_0 = arith.constant 0 : i32
    %c0_i32_1 = arith.constant 0 : i32
    return %c0_i32, %c0_i32_0 : i32, i32
  }
  func.func @transform_7(%arg0: i32) -> (i32, i32) {
    %c0_i32 = arith.constant 0 : i32
    %c0_i32_0 = arith.constant 0 : i32
    return %c0_i32, %arg0 : i32, i32
  }
}

</mosaic_0001>

<bundles_post_ra>
// kernel: tpu_custom_call.1
= control target key start
LH: loop header
LB: loop body
LE: loop exit
PB: predicated region body
PF: predicated region fallthrough
CT: control target
= control target key end

     0   :  { %vm122_vm0 = vcmask 1045504   ;;  %v395_v5 = vmov 0   ;;  %s515_s0 = inlined_call_operand.vmem [shape: f32[12,8], index: 0, kind: input, shape index: {}]   ;;  %s516_s1 = inlined_call_operand.vmem [shape: f32[4,8], index: 1, kind: input, shape index: {}]   ;;  %s517_s2 = inlined_call_operand.vmem [shape: bf16[64,12], index: 2, kind: input, shape index: {}]   ;;  %s518_s3 = inlined_call_operand.vmem [shape: f32[64,1], index: 3, kind: input, shape index: {}]   ;;  %s519_s4 = inlined_call_operand.vmem [shape: bf16[32,64], index: 4, kind: input, shape index: {}]   ;;  %s520_s5 = inlined_call_operand.vmem [shape: bf16[32,4], index: 5, kind: input, shape index: {}]   ;;  %s521_s6 = inlined_call_operand.vmem [shape: f32[32,1], index: 6, kind: input, shape index: {}]   ;;  %s522_s7 = inlined_call_operand.hbm [shape: f32[1,8], index: 7, kind: output, shape index: {}]  }
   0x1   :  { %v28_v0 = vld [vmem:[%s515_s0] sm:$0xff]  ;;  %v29_v1 = vld [vmem:[%s515_s0 + $0x8] sm:$0xf]  ;;  %v47_v3 = vld [vmem:[%s518_s3 + $0x30] sm:$0xff]  ;;  %366 = vset.pattern.permute.xlu0 %v395_v5  ;;  %367 = vset.pattern.permute.xlu1 %v395_v5 }
   0x2   :  { %v30_v2 = vpack.c.bf16 %v29_v1, %v28_v0  ;;  %v45_v4 = vld [vmem:[%s518_s3 + $0x20] sm:$0xff] }
   0x3   :  { %12 = vsyncpa [#allocation3], 0  ;;  %v356_v7 = vld [vmem:[%s517_s2 + $0x8] sm:$0xff]  ;;  %81 = vperm.xlu0 %366, %v47_v3   ;;  %71 = vperm.xlu1 %367, %v45_v4   ;;  %v355_v8 = vld [vmem:[%s517_s2] sm:$0xff]  ;;  %vm109_vm1 = vcmask 97280   ;;  %vm192_vm2 = vcmask 1041408  }
   0x4   :  { %v124_v6 = vsel %vm122_vm0, %v30_v2, 0  ;;  %368 = vset.pattern.permute.xlu2 %v395_v5  ;;  %v43_v9 = vld [vmem:[%s518_s3 + $0x10] sm:$0xff]  ;;  %v48_v10 = vld [vmem:[%s518_s3 + $0x38] sm:$0xff]  ;;  %v46_v11 = vld [vmem:[%s518_s3 + $0x28] sm:$0xff]  ;;  %vm185_vm3 = vcmask 31744   ;;  %vm225_vm4 = vcmask 523264  }
   0x5   :  { %363 = vmatpush.bf16.msra.mxu3 %v124_v6  ;;  %133 = vmatpush.bf16.msra.mxu0 %v124_v6  ;;  %v44_v12 = vld [vmem:[%s518_s3 + $0x18] sm:$0xff]  ;;  %v41_v13 = vld [vmem:[%s518_s3] sm:$0xff]  ;;  %v42_v14 = vld [vmem:[%s518_s3 + $0x8] sm:$0xff]  ;;  %vm283_vm5 = vcmask 64512   ;;  %s306_s20 = sshll.u32 %s522_s7, 4  ;;  %vm297_vm6 = vcmask 57344   ;;  %s307_s20 = int_to_ptr.hbm [resolvable:$true] %s306_s20 }
   0x6   :  { %61 = vperm.xlu2 %368, %v43_v9   ;;  %v357_v15 = vld [vmem:[%s517_s2 + $0x10] sm:$0xff]  ;;  %v255_v16 = vld [vmem:[%s521_s6] sm:$0xff]  ;;  %v256_v17 = vld [vmem:[%s521_s6 + $0x8] sm:$0xff] }
   0x7   :  { %v257_v18 = vld [vmem:[%s521_s6 + $0x10] sm:$0xff]  ;;  %v258_v19 = vld [vmem:[%s521_s6 + $0x18] sm:$0xff]  ;;  %v31_v24 = vld [vmem:[%s516_s1] sm:$0xf] }
   0x8   :  { %332 = vmatmul.msk.bf16.vlgmr.msra.gmra.mxu3 %vm109_vm1, %v356_v7  ;;  %331 = vmatmul.msk.bf16.vlgmr.msra.gmra.mxu0 %vm109_vm1, %v355_v8  ;;  %v358_v20 = vld [vmem:[%s517_s2 + $0x18] sm:$0xff]  ;;  %v32_v25 = vpack.c.bf16 %v31_v24, %v31_v24  ;;  %v361_v28 = vld [vmem:[%s520_s5] sm:$0xff]  ;;  %v362_v38 = vld [vmem:[%s520_s5 + $0x8] sm:$0xff] }
   0x9   :  { %v359_v62 = vld [vmem:[%s519_s4] sm:$0xff]  ;;  %v360_v63 = vld [vmem:[%s519_s4 + $0x8] sm:$0xff]  ;;  %s396_s4 = smov [#allocation2]  }
   0xa   :  { %v194_v27 = vsel %vm192_vm2, %v32_v25, 0  ;;  %s304_s17 = sshll.u32 %s396_s4, 4  ;;  %s305_s17 = int_to_ptr.vmem [resolvable:$true] %s304_s17 }
   0xb   :  { %86 = vperm.xlu0 %366, %v48_v10   ;;  %76 = vperm.xlu1 %367, %v46_v11  }
   0xc   :  { %203 = vmatpush.bf16.msra.mxu1 %v194_v27 }
   0xe   :  { %66 = vperm.xlu2 %368, %v44_v12  }
   0xf   :  { %343 = vmatmul.msk.bf16.vlgmr.msra.gmra.mxu1 %vm185_vm3, %v361_v28 }
  0x13   :  { %51 = vperm.xlu0 %366, %v41_v13   ;;  %56 = vperm.xlu1 %367, %v42_v14  }
  0x16   :  { %261 = vperm.xlu2 %368, %v255_v16  }
  0x18   :  { %333 = vmatmul.msk.bf16.gmra.mxu3 %vm109_vm1, %v357_v15 }
  0x1b   :  { %266 = vperm.xlu0 %366, %v256_v17   ;;  %271 = vperm.xlu1 %367, %v257_v18  }
  0x1e   :  { %276 = vperm.xlu2 %368, %v258_v19  }
  0x1f   :  { %344 = vmatmul.msk.bf16.gmra.mxu1 %vm185_vm3, %v362_v38 }
  0x28   :  { %334 = vmatmul.msk.bf16.gmra.mxu3 %vm109_vm1, %v358_v20 }
  0x60   :  { %v62_v31 = vpop.permute.xlu2 %61 }
  0x68   :  { %v67_v41 = vpop.permute.xlu2 %66 }
  0x70   :  { %v262_v10 = vpop.permute.xlu2 %261 }
  0x75   :  { %v82_v29 = vpop.permute.xlu0 %81  ;;  %v72_v30 = vpop.permute.xlu1 %71 }
  0x78   :  { %v277_v25 = vpop.permute.xlu2 %276 }
  0x7d   :  { %v87_v34 = vpop.permute.xlu0 %86  ;;  %v77_v35 = vpop.permute.xlu1 %76 }
  0x85   :  { %v135_v33 = vpop.f32.mrf.mxu0  ;;  %v52_v51 = vpop.permute.xlu0 %51 }
  0x86   :  { %v57_v52 = vpop.permute.xlu1 %56  ;;  %v136_v54 = vadd.f32 %v135_v33, %v52_v51 }
  0x88   :  { %v155_v58 = vmax.f32 %v136_v54, 0.0 }
  0x8b   :  { %v140_v21 = vpop.f32.mrf.mxu3 }
  0x8c   :  { %v141_v49 = vadd.f32 %v140_v21, %v62_v31  ;;  %v205_v0 = vpop.f32.mrf.mxu1 }
  0x8d   :  { %v137_v48 = vpop.f32.mrf.mxu0  ;;  %v267_v13 = vpop.permute.xlu0 %266 }
  0x8e   :  { %v138_v55 = vadd.f32 %v137_v48, %v57_v52  ;;  %v157_v57 = vmax.f32 %v141_v49, 0.0  ;;  %v272_v15 = vpop.permute.xlu1 %271 }
  0x90   :  { %v156_v59 = vmax.f32 %v138_v55, 0.0 }
  0x92   :  { %v167_v61 = vpack.c.bf16 %v156_v59, %v155_v58 }
  0x93   :  { %v142_v22 = vpop.f32.mrf.mxu3 }
  0x94   :  { %v143_v45 = vadd.f32 %v142_v22, %v67_v41  ;;  %v207_v2 = vpop.f32.mrf.mxu1 }
  0x96   :  { %v158_v53 = vmax.f32 %v143_v45, 0.0 }
  0x98   :  { %v168_v60 = vpack.c.bf16 %v158_v53, %v157_v57 }
  0x9b   :  { %v145_v23 = vpop.f32.mrf.mxu3 }
  0x9c   :  { %v146_v42 = vadd.f32 %v145_v23, %v72_v30  ;;  %v210_v5 = vpop.f32.mrf.mxu1 }
  0x9e   :  { %v159_v50 = vmax.f32 %v146_v42, 0.0 }
  0xa3   :  { %v147_v26 = vpop.f32.mrf.mxu3 }
  0xa4   :  { %v148_v39 = vadd.f32 %v147_v26, %v77_v35  ;;  %v212_v18 = vpop.f32.mrf.mxu1 }
  0xa6   :  { %v160_v46 = vmax.f32 %v148_v39, 0.0 }
  0xa8   :  { %v169_v56 = vpack.c.bf16 %v160_v46, %v159_v50 }
  0xab   :  { %v150_v32 = vpop.f32.mrf.mxu3 }
  0xac   :  { %v151_v36 = vadd.f32 %v150_v32, %v82_v29 }
  0xae   :  { %v161_v43 = vmax.f32 %v151_v36, 0.0 }
  0xb3   :  { %v152_v37 = vpop.f32.mrf.mxu3 }
  0xb4   :  { %v153_v40 = vadd.f32 %v152_v37, %v87_v34 }
  0xb6   :  { %v162_v44 = vmax.f32 %v153_v40, 0.0 }
  0xb8   :  { %v170_v47 = vpack.c.bf16 %v162_v44, %v161_v43 }
  0xba   :  { %236 = vmatpush.bf16.msra.mxu2 %v170_v47 }
  0xbe   :  { %237 = vmatpush.bf16.msra.mxu2 %v169_v56 }
  0xc2   :  { %238 = vmatpush.bf16.msra.mxu2 %v168_v60 }
  0xc6   :  { %239 = vmatpush.bf16.msra.mxu2 %v167_v61 }
  0xc9   :  { %353 = vmatmul.msk.bf16.vlgmr.msra.gmra.mxu2 %vm225_vm4, %v359_v62 }
  0xd9   :  { %354 = vmatmul.msk.bf16.gmra.mxu2 %vm225_vm4, %v360_v63 }
 0x14c   :  { %v241_v1 = vpop.f32.mrf.mxu2 }
 0x14d   :  { %v242_v6 = vadd.f32 %v241_v1, %v205_v0 }
 0x14f   :  { %v251_v11 = vmax.f32 %v242_v6, 0.0 }
 0x151   :  { %v279_v16 = vmul.f32 %v262_v10, %v251_v11 }
 0x153   :  { %v284_v22 = vsel %vm283_vm5, %v279_v16, 0.0 }
 0x154   :  { %v243_v3 = vpop.f32.mrf.mxu2 }
 0x155   :  { %v244_v4 = vadd.f32 %v243_v3, %v207_v2 }
 0x157   :  { %v252_v8 = vmax.f32 %v244_v4, 0.0 }
 0x159   :  { %v280_v14 = vmul.f32 %v267_v13, %v252_v8 }
 0x15b   :  { %v285_v20 = vsel %vm283_vm5, %v280_v14, 0.0 }
 0x15c   :  { %v246_v7 = vpop.f32.mrf.mxu2  ;;  %v286_v26 = vadd.f32 %v285_v20, %v284_v22 }
 0x15d   :  { %v247_v9 = vadd.f32 %v246_v7, %v210_v5 }
 0x15f   :  { %v253_v12 = vmax.f32 %v247_v9, 0.0 }
 0x161   :  { %v281_v17 = vmul.f32 %v272_v15, %v253_v12 }
 0x163   :  { %v287_v23 = vsel %vm283_vm5, %v281_v17, 0.0 }
 0x164   :  { %v248_v19 = vpop.f32.mrf.mxu2  ;;  %v288_v28 = vadd.f32 %v287_v23, %v286_v26 }
 0x165   :  { %v249_v21 = vadd.f32 %v248_v19, %v212_v18 }
 0x167   :  { %v254_v24 = vmax.f32 %v249_v21, 0.0 }
 0x169   :  { %v282_v27 = vmul.f32 %v277_v25, %v254_v24 }
 0x16b   :  { %v289_v29 = vsel %vm283_vm5, %v282_v27, 0.0 }
 0x16c   :  { %v290_v30 = vadd.f32 %v289_v29, %v288_v28 }
 0x16e   :  { %v291_v31 = vrot.slane %v290_v30, 4 }
 0x170   :  { %v292_v32 = vadd.f32 %v291_v31, %v290_v30 }
 0x172   :  { %v293_v33 = vrot.slane %v292_v32, 2 }
 0x174   :  { %v294_v34 = vadd.f32 %v293_v33, %v292_v32 }
 0x176   :  { %v295_v35 = vrot.slane %v294_v34, 1 }
 0x178   :  { %v296_v36 = vadd.f32 %v295_v35, %v294_v34 }
 0x17a   :  { %298 = vst.msk [vmem:[#allocation2] sm:$0x1] %vm297_vm6, %v296_v36 }
 0x17b   :  { %309 = dma.vmem_to_hbm [thread:$0]  %s305_s17, 16, %s307_s20, [#allocation3]  }
 0x17c   :  { %393 = dma.done.wait [#allocation3], 16  }
 0x17d   :  { %394 = vsyncadd [#allocation3], 4294967280 }
 0x17e   :  { %314 = vsyncpa [#allocation3], 1 }

</bundles_post_ra>
